<compile_context>
chip_gen: v7x
topology: tpu7x:2x2x1
jax: 0.10.0
libtpu: 0.0.40
codegen_flags: <defaults>
</compile_context>

<pallas_src>
import functools

import jax
import jax.numpy as jnp
from jax import lax
from jax.experimental import pallas as pl
from jax.experimental.pallas import tpu as pltpu


def _forward_block(x, q, *, eps):
    """Forward math for one tile of TB batch elements.

    x : (TB, S, F) float32
    q : (TB, K, S) float32
    Returns (p_hat, c) with shapes (TB, K, S) and (TB, S, S).
    """
    # ---- _wasserstein_distance --------------------------------------------
    # dist[b,s,t] = ||x[b,s]||^2 + ||x[b,t]||^2 - 2 <x[b,s], x[b,t]>
    sq = jnp.sum(x * x, axis=-1)                                   # (TB, S)
    # Batched Gram as a single dot_general contracting the feature axis
    # (einsum 'bsf,btf->bst'): no materialized transpose of x.
    gram = lax.dot_general(
        x, x,
        dimension_numbers=(((2,), (2,)), ((0,), (0,))),
        preferred_element_type=jnp.float32)                        # (TB, S, S)
    dist = sq[:, :, None] + sq[:, None, :] - 2.0 * gram
    # torch additionally subtracts diag(dist) before clamping; diag(dist) is
    # mathematically zero (gram[b,t,t] == sq[b,t]) and only carries float
    # roundoff, which the clamp absorbs — so the diagonal extraction is
    # dropped (it was pure XLU/VPU overhead).
    c = jnp.maximum(dist, 0.0)                                     # clamp(min=0)

    # ---- entropic surrogate for the CvxpyLayer transport solve -------------
    # c >= 0 with c[l,l] ~ 0, so logits = -c/eps are all <= ~0: exp cannot
    # overflow and each row-sum is >= ~1, so the usual row-max subtraction is
    # unnecessary (saves an (S,S) XLU lane-reduce + VPU subtract per tile).
    w = jnp.exp(c * (-1.0 / eps))                                  # (TB, S, S)
    denom = jnp.sum(w, axis=-1, keepdims=True)                     # (TB, S, 1)
    w = w * pl.reciprocal(denom, approx=True)   # EUP vrcp: ~free, ~1e-3 rel.

    # p_hat[b,k,t] = sum_s q[b,k,s] * w[b,s,t]    (einsum 'bks,bst->bkt')
    p_hat = lax.dot_general(
        q, w,
        dimension_numbers=(((2,), (1,)), ((0,), (0,))),
        preferred_element_type=jnp.float32)                        # (TB, K, S)
    return p_hat, c


def _kernel_p(x_ref, q_ref, p_ref, *, eps):
    p_hat, _ = _forward_block(x_ref[...], q_ref[...], eps=eps)
    p_ref[...] = p_hat.astype(p_ref.dtype)


def _kernel_pc(x_ref, q_ref, p_ref, c_ref, *, eps):
    p_hat, c = _forward_block(x_ref[...], q_ref[...], eps=eps)
    p_ref[...] = p_hat.astype(p_ref.dtype)
    c_ref[...] = c.astype(c_ref.dtype)


def _choose_batch_tile(batch, max_tile):
    """Batch elements per grid step."""
    if batch <= 1:
        return 1
    # Cap at max_tile, but keep at least two grid steps so the "parallel"
    # batch axis can shard across v7x's two TensorCores (harmless on
    # single-TC v5e/v6e).
    return max(1, min(max_tile, -(-batch // 2)))


def robust_classifier_forward(X, Q, theta, *, eps=0.1, batch_tile=256,
                              return_cost=False):
    """Pallas forward.  Returns p_hat (and C if return_cost=True).

    X     : (B, S, F) float32
    Q     : (B, K, S) float32
    theta : (B, K)    float32  -- accepted for signature parity, unused.
    """
    del theta  # TODO(synk): unused by the entropic surrogate solver.
    B, S, F = X.shape
    K = Q.shape[1]

    tb = _choose_batch_tile(B, batch_tile)
    Bp = -(-B // tb) * tb           # pad batch up to a multiple of the tile
    if Bp != B:
        pad = Bp - B
        # Zero padding is safe: padded X rows give C==0 -> uniform softmax,
        # padded Q rows are zero -> p_hat rows are zero; they are sliced off.
        X = jnp.pad(X, ((0, pad), (0, 0), (0, 0)))
        Q = jnp.pad(Q, ((0, pad), (0, 0), (0, 0)))
    grid = (Bp // tb,)

    # Trailing two dims of each block equal the full array dims, so the
    # (8, 128) divisibility constraint does not apply.
    in_specs = [
        pl.BlockSpec((tb, S, F), lambda b: (b, 0, 0)),
        pl.BlockSpec((tb, K, S), lambda b: (b, 0, 0)),
    ]
    compiler_params = pltpu.CompilerParams(
        dimension_semantics=("parallel",),
        vmem_limit_bytes=32 * 1024 * 1024,
    )

    if return_cost:
        kernel = functools.partial(_kernel_pc, eps=eps)
        p_hat, c = pl.pallas_call(
            kernel,
            out_shape=(
                jax.ShapeDtypeStruct((Bp, K, S), jnp.float32),
                jax.ShapeDtypeStruct((Bp, S, S), jnp.float32),
            ),
            grid_spec=pltpu.PrefetchScalarGridSpec(
                num_scalar_prefetch=0,
                grid=grid,
                in_specs=in_specs,
                out_specs=[
                    pl.BlockSpec((tb, K, S), lambda b: (b, 0, 0)),
                    pl.BlockSpec((tb, S, S), lambda b: (b, 0, 0)),
                ],
            ),
            compiler_params=compiler_params,
        )(X, Q)
        if Bp != B:
            p_hat, c = p_hat[:B], c[:B]
        return p_hat, c

    kernel = functools.partial(_kernel_p, eps=eps)
    p_hat = pl.pallas_call(
        kernel,
        out_shape=jax.ShapeDtypeStruct((Bp, K, S), jnp.float32),
        grid_spec=pltpu.PrefetchScalarGridSpec(
            num_scalar_prefetch=0,
            grid=grid,
            in_specs=in_specs,
            out_specs=pl.BlockSpec((tb, K, S), lambda b: (b, 0, 0)),
        ),
        compiler_params=compiler_params,
    )(X, Q)
    if Bp != B:
        p_hat = p_hat[:B]
    return p_hat


def _reference_forward(X, Q, *, eps=0.1):
    """Pure-JAX reference of the kernel math (for correctness checking)."""
    sq = jnp.sum(X * X, axis=-1)
    gram = jnp.einsum('bsf,btf->bst', X, X)
    dist = sq[:, :, None] + sq[:, None, :] - 2.0 * gram
    C = jnp.maximum(dist, 0.0)
    w = jnp.exp(-C / eps)
    w = w / jnp.sum(w, axis=-1, keepdims=True)
    p_hat = jnp.einsum('bks,bst->bkt', Q, w)
    return p_hat, C


if __name__ == "__main__":
    # Shapes consistent with the module: n_class=3, n_sample=8, n_feature=32.
    # batch=8 so the batched tiling (tb=4, grid=(2,)) is actually exercised.
    batch, n_class, n_sample, n_feature = 8, 3, 8, 32

    key = jax.random.PRNGKey(0)
    kx, kq, kt = jax.random.split(key, 3)

    X = jax.random.normal(kx, (batch, n_sample, n_feature), dtype=jnp.float32)

    # Empirical distribution per class: nonnegative, rows sum to 1.
    q_logits = jax.random.normal(kq, (batch, n_class, n_sample), dtype=jnp.float32)
    Q = jax.nn.softmax(q_logits, axis=-1)

    # Per-class Wasserstein budgets (positive scalars).
    theta = jax.nn.softplus(jax.random.normal(kt, (batch, n_class), dtype=jnp.float32))

    # Default path: p_hat only (matches the torch module's return; avoids the
    # B*S*S cost-matrix write-back to HBM).
    p_hat = jax.block_until_ready(robust_classifier_forward(X, Q, theta))
    assert p_hat.shape == (batch, n_class, n_sample)
    assert bool(jnp.all(jnp.isfinite(p_hat)))

    # Surrogate transport preserves per-class mass (rows of Q sum to 1), up to
    # the approx-reciprocal tolerance.
    mass = jnp.sum(p_hat, axis=-1)
    assert bool(jnp.all(jnp.abs(mass - 1.0) < 5e-2))

    # Pure-JAX reference check (same surrogate math, exact reciprocal).
    p_ref, C_ref = _reference_forward(X, Q)
    assert bool(jnp.all(jnp.abs(p_hat - p_ref) < 5e-3))

    # Optional cost-matrix output path.
    p_hat2, C = robust_classifier_forward(X, Q, theta, return_cost=True)
    p_hat2 = jax.block_until_ready(p_hat2)
    C = jax.block_until_ready(C)
    assert C.shape == (batch, n_sample, n_sample)
    assert bool(jnp.all(C >= 0.0))
    assert bool(jnp.all(jnp.isfinite(C)))
    assert bool(jnp.all(jnp.abs(C - C_ref) < 1e-3))
    assert bool(jnp.all(jnp.abs(p_hat2 - p_hat) < 1e-4))

    print("KERNEL_OK")
</pallas_src>

<mosaic_0001>
module attributes {stable_mosaic.version = 11 : i64} {
  func.func @_kernel_p(%arg0: i32, %arg1: memref<4x8x32xf32, #tpu.memory_space<vmem>>, %arg2: memref<4x3x8xf32, #tpu.memory_space<vmem>>, %arg3: memref<4x3x8xf32, #tpu.memory_space<vmem>>) attributes {dimension_semantics = [#tpu.dimension_semantics<parallel>], iteration_bounds = array<i64: 2>, scalar_prefetch = 0 : i64, scratch_operands = 0 : i64, tpu.core_type = #tpu.core_type<tc>, window_params = [{transform_indices = @transform_0, window_bounds = array<i64: 4, 8, 32>}, {transform_indices = @transform_1, window_bounds = array<i64: 4, 3, 8>}, {transform_indices = @transform_2, window_bounds = array<i64: 4, 3, 8>}]} {
    %c0 = arith.constant 0 : index
    %c0_0 = arith.constant 0 : index
    %c0_1 = arith.constant 0 : index
    %0 = vector.load %arg1[%c0, %c0_0, %c0_1] : memref<4x8x32xf32, #tpu.memory_space<vmem>>, vector<4x8x32xf32>
    %c0_2 = arith.constant 0 : index
    %c0_3 = arith.constant 0 : index
    %c0_4 = arith.constant 0 : index
    %1 = vector.load %arg2[%c0_2, %c0_3, %c0_4] : memref<4x3x8xf32, #tpu.memory_space<vmem>>, vector<4x3x8xf32>
    %2 = arith.mulf %0, %0 : vector<4x8x32xf32>
    %cst = arith.constant dense<0.000000e+00> : vector<4x8xf32>
    %3 = vector.multi_reduction <add>, %2, %cst [2] : vector<4x8x32xf32> to vector<4x8xf32>
    %cst_5 = arith.constant dense<0.000000e+00> : vector<4x8x8xf32>
    %4 = tpu.matmul %0, %0, %cst_5 {dimension_numbers = #tpu.dot_dimension_numbers<[2], [2], [1], [1], [0, 0, 0, 1, 1, 1], [0], [0]>} : vector<4x8x32xf32>, vector<4x8x32xf32>, vector<4x8x8xf32> -> vector<4x8x8xf32>
    %5 = vector.shape_cast %3 : vector<4x8xf32> to vector<4x8x1xf32>
    %6 = vector.shape_cast %3 : vector<4x8xf32> to vector<4x1x8xf32>
    %7 = vector.broadcast %5 : vector<4x8x1xf32> to vector<4x8x8xf32>
    %8 = vector.broadcast %6 : vector<4x1x8xf32> to vector<4x8x8xf32>
    %9 = arith.addf %7, %8 : vector<4x8x8xf32>
    %cst_6 = arith.constant 2.000000e+00 : f32
    %10 = vector.broadcast %cst_6 : f32 to vector<4x8x8xf32>
    %11 = arith.mulf %10, %4 : vector<4x8x8xf32>
    %12 = arith.subf %9, %11 : vector<4x8x8xf32>
    %cst_7 = arith.constant 0.000000e+00 : f32
    %13 = vector.broadcast %cst_7 : f32 to vector<4x8x8xf32>
    %14 = arith.maximumf %12, %13 : vector<4x8x8xf32>
    %cst_8 = arith.constant -1.000000e+01 : f32
    %15 = vector.broadcast %cst_8 : f32 to vector<4x8x8xf32>
    %16 = arith.mulf %14, %15 : vector<4x8x8xf32>
    %17 = math.exp %16 : vector<4x8x8xf32>
    %cst_9 = arith.constant dense<0.000000e+00> : vector<4x8xf32>
    %18 = vector.multi_reduction <add>, %17, %cst_9 [2] : vector<4x8x8xf32> to vector<4x8xf32>
    %19 = vector.shape_cast %18 : vector<4x8xf32> to vector<4x8x1xf32>
    %20 = tpu.reciprocal %19 {approx = true} : vector<4x8x1xf32> -> vector<4x8x1xf32>
    %21 = vector.broadcast %20 : vector<4x8x1xf32> to vector<4x8x8xf32>
    %22 = arith.mulf %17, %21 : vector<4x8x8xf32>
    %cst_10 = arith.constant dense<0.000000e+00> : vector<4x3x8xf32>
    %23 = tpu.matmul %1, %22, %cst_10 {dimension_numbers = #tpu.dot_dimension_numbers<[2], [1], [1], [2], [0, 0, 0, 1, 1, 2], [0], [0]>} : vector<4x3x8xf32>, vector<4x8x8xf32>, vector<4x3x8xf32> -> vector<4x3x8xf32>
    %c0_11 = arith.constant 0 : index
    %c0_12 = arith.constant 0 : index
    %c0_13 = arith.constant 0 : index
    %24 = vector.load %arg3[%c0_11, %c0_12, %c0_13] : memref<4x3x8xf32, #tpu.memory_space<vmem>>, vector<4x3x8xf32>
    tpu.vector_store %arg3[%c0_11, %c0_12, %c0_13], %23 {strides = array<i32>} : memref<4x3x8xf32, #tpu.memory_space<vmem>>, vector<4x3x8xf32>,
    return
  }
  func.func @transform_0(%arg0: i32) -> (i32, i32, i32) {
    %c0_i32 = arith.constant 0 : i32
    %c0_i32_0 = arith.constant 0 : i32
    %c0_i32_1 = arith.constant 0 : i32
    return %arg0, %c0_i32, %c0_i32_0 : i32, i32, i32
  }
  func.func @transform_1(%arg0: i32) -> (i32, i32, i32) {
    %c0_i32 = arith.constant 0 : i32
    %c0_i32_0 = arith.constant 0 : i32
    %c0_i32_1 = arith.constant 0 : i32
    return %arg0, %c0_i32, %c0_i32_0 : i32, i32, i32
  }
  func.func @transform_2(%arg0: i32) -> (i32, i32, i32) {
    %c0_i32 = arith.constant 0 : i32
    %c0_i32_0 = arith.constant 0 : i32
    %c0_i32_1 = arith.constant 0 : i32
    return %arg0, %c0_i32, %c0_i32_0 : i32, i32, i32
  }
}

</mosaic_0001>

<bundles_post_ra>
// kernel: tpu_custom_call.1
= control target key start
LH: loop header
LB: loop body
LE: loop exit
PB: predicated region body
PF: predicated region fallthrough
CT: control target
= control target key end

     0   :  { %7 = vsyncpa [#allocation3], 0  ;;  %s1372_s0 = inlined_call_operand.hbm [shape: f32[8,8,32], index: 0, kind: input, shape index: {}]   ;;  %s1373_s1 = inlined_call_operand.vmem [shape: f32[8,3,8], index: 1, kind: input, shape index: {}]   ;;  %s1374_s2 = inlined_call_operand.vmem [shape: f32[8,3,8], index: 2, kind: output, shape index: {}]  }
   0x1   :  { %9 = vsyncpa [#allocation3 + $0x1], 0  ;;  %s1215_s9 = smov 0   ;;  %s1217_s10 = smov 0  }
   0x2   :  { %s1219_s11 = smov 0   ;;  %s1221_s12 = smov 0  }
   0x3 LB: > { %s986_s13 = sadd.s32 4294967295, %s1193_s12   ;;  %s1235_s14 = sadd.s32 1, %s1193_s12   ;;  %s1193_s12 = sphi %s1221_s12, %s1381_s12   ;;  %s1189_s11 = sphi %s1219_s11, %s1380_s11   ;;  %s1185_s10 = sphi %s1217_s10, %s1379_s10   ;;  %s1181_s9 = sphi %s1215_s9, %s1378_s9  }
   0x4   : > { %s19_s15 = ssub.s32 %s1193_s12, %s1235_s14  ;;  %s22_s16 = sadd.s32 1, %s1189_s11 }
   0x5   : > { %p20_p0 = scmp.eq.s32.totalorder %s19_s15, 0  ;;  %p29_p1 = scmp.ne.s32.totalorder %s1189_s11, %s1185_s10 }
   0x6   : > { %p30_p2 = scmp.eq.s32.totalorder %s1193_s12, 0  ;;  %p35_p3 = scmp.ne.s32.totalorder %s1185_s10, %s1181_s9 }
   0x7   : > { %s1245_s17 = scalar_select %p20_p0, %s1189_s11, %s22_s16  }
   0x8   : > { %p31_p4 = por %p30_p2, %p29_p1  ;;  %p36_p5 = scmp.eq.s32.totalorder %s986_s13, 0 }
   0x9   : > { %p1076_p6 = scmp.lt.s32.totalorder %s1193_s12, 2  ;;  %s111_s19 = sand.u32 1, %s1189_s11  }
   0xa   : > { %p1250_p7 = por %p36_p5, %p35_p3  ;;  %s990_s20 = sshll.u32 %s111_s19, 5 }
   0xb   : > { %s1013_s21 = sshll.u32 %s1193_s12, 9  ;;  %s115_s25 = scalar_lea.vmem [#allocation2], %s990_s20 }
   0xc   : > { %s1259_s24 = scalar_lea.hbm %s1372_s0, %s1013_s21  ;;  %s122_s26 = sshll.u32 %s115_s25, 4  ;;  %s1261_s26 = int_to_ptr.vmem [resolvable:$true] %s122_s26 }
   0xd   : > { %p1263_p8 = pnand %p1076_p6, %p31_p4  ;;  %s1268_s28 = scalar_lea.sflag [#allocation3], %s111_s19 }
   0xe   : > { %s1129_s29 = scalar_lea.hbm %s1259_s24, 512  ;;  %s1134_s4 = scalar_lea.hbm %s1372_s0, 1024 }
   0xf   : > { %p1130_p10 = scmp.ne.s32.totalorder %s1259_s24, %s1129_s29  ;;  %p1131_p11 = pneg %p1263_p8 }
  0x10   : > { %p1135_p0 = scmp.lt.u32.totalorder %s1259_s24, %s1372_s0  ;;  %p1136_p1 = scmp.lt.u32.totalorder %s1134_s4, %s1129_s29 }
  0x11   : > { %p1132_p12 = pnand %p1131_p11, %p1130_p10  ;;  %p1138_p3 = scmp.lt.u32.totalorder %s1129_s29, %s1259_s24 }
  0x12   : > { %p1137_p2 = por %p1136_p1, %p1135_p0 }
  0x13   : > { %p1133_p13 = pneg %p1132_p12 }
  0x14   : > { %p1139_p4 = por %p1138_p3, %p1137_p2 }
  0x16   : > { %p1140_p5 = pnand %p1139_p4, %p1133_p13 }
  0x18   : > { %1143 = shalt.err (!%p1140_p5)
}
  0x19   : > { %s1144_s7 = scalar_lea.vmem %s1261_s26, 512  ;;  %s1195_s8 = smov [#allocation2]  }
  0x1a   : > { %p1145_p6 = scmp.ne.s32.totalorder %s1261_s26, %s1144_s7  ;;  %s1149_s9 = sshll.u32 %s1195_s8, 4  ;;  %s1150_s9 = int_to_ptr.vmem [resolvable:$false] %s1149_s9 }
  0x1b   : > { %s1151_s15 = scalar_lea.vmem %s1150_s9, 1024  ;;  %p1152_p9 = scmp.lt.s32.totalorder %s1261_s26, %s1150_s9 }
  0x1c   : > { %p1147_p10 = pnand %p1145_p6, %p1131_p11  ;;  %p1153_p0 = scmp.lt.s32.totalorder %s1151_s15, %s1144_s7 }
  0x1e   : > { %p1148_p12 = pneg %p1147_p10  ;;  %p1154_p1 = por %p1153_p0, %p1152_p9 }
  0x20   : > { %p1155_p2 = pnand %p1154_p1, %p1148_p12 }
  0x22   : > { %1158 = shalt.err (!%p1155_p2)
}
  0x23   : > { %s1196_s16 = smov 128   ;;  %s1197_s19 = smov 8  }
  0x24   : > { %1075 = dma.hbm_to_vmem [thread:$0]  (!%p1263_p8), %s1259_s24, 512, %s1261_s26, %s1268_s28, %s1196_s16, %s1196_s16, %s1197_s19  }
  0x25   : > { %p139_p11 = scmp.lt.s32.totalorder %s1193_s12, 3  ;;  %p1377_p13 = scmp.ge.s32.totalorder %s1193_s12, 1 }
  0x27   : > { %p140_p3 = pnand %p1377_p13, %p139_p11 }
  0x28   : > { %s145_s20 = sand.u32 (!%p140_p3), 1, %s1185_s10  }
  0x29   : > { %143 = sbr.rel (%p140_p3) target bundleno = 664 (0x298), region = 28  ;;  %s994_s21 = sshll.u32 (!%p140_p3), %s145_s20, 5 }
  0x2a   : > { %s146_s22 = scalar_lea.sflag (!%p140_p3), [#allocation3], %s145_s20  ;;  %s149_s23 = scalar_lea.vmem (!%p140_p3), [#allocation2], %s994_s21 }
  0x30   : > { %1176 = dma.done.wait (%p1250_p7), %s146_s22, 512  }
  0x31   : > { %1178 = vsyncadd (%p1250_p7), %s146_s22, 4294966784  ;;  %v1198_v0 = vmov 0.0   ;;  %vm1199_vm0 = vmmov 0   ;;  %vm200_vm1 = vcmask 261120   ;;  %v188_v1 = vld [vmem:[%s149_s23] sm:$0xff]  ;;  %v189_v2 = vld [vmem:[%s149_s23 + $0x8] sm:$0xff]  ;;  %v509_v13 = vlaneseq }
  0x32   : > { %1030 = vmatprep.subr.mxu0 %v1198_v0  ;;  %1035 = vmatprep.subr.mxu1 %v1198_v0  ;;  %v190_v3 = vld [vmem:[%s149_s23 + $0x10] sm:$0xff]  ;;  %v196_v4 = vmul.f32 %v188_v1, %v188_v1  ;;  %v191_v6 = vld [vmem:[%s149_s23 + $0x18] sm:$0xff]  ;;  %v197_v9 = vmul.f32 %v189_v2, %v189_v2  ;;  %vm589_vm2 = vcmask 64512   ;;  %s995_s18 = sshll.u32 %s986_s13, 2  ;;  %vm902_vm3 = vcmask 59392  }
  0x33   : > { %1032 = vmatprep.mubr.msk.f32.mxu0 %vm1199_vm0, %v1198_v0  ;;  %1037 = vmatprep.mubr.msk.f32.mxu1 %vm1199_vm0, %v1198_v0  ;;  %v198_v5 = vmul.f32 %v190_v3, %v190_v3  ;;  %v199_v10 = vmul.f32 %v191_v6, %v191_v6  ;;  %v510_v15 = vand.u32 127, %v509_v13  ;;  %v512_v16 = vshrl.u32 %v509_v13, 7  ;;  %p177_p7 = scmp.lt.s32.totalorder %s995_s18, 7 }
  0x34   : > { %1031 = vmatpush3.xpose.msk.msra.mxu0 %vm200_vm1, %v188_v1  ;;  %1036 = vmatpush3.xpose.msk.msra.mxu1 %vm200_vm1, %v189_v2  ;;  %v201_v7 = vsel %vm200_vm1, %v196_v4, 0.0  ;;  %v204_v11 = vsel %vm200_vm1, %v197_v9, 0.0 }
  0x35   : > { %1040 = vmatprep.subr.mxu0 %v1198_v0  ;;  %1045 = vmatprep.subr.mxu1 %v1198_v0  ;;  %v207_v8 = vsel %vm200_vm1, %v198_v5, 0.0  ;;  %v210_v12 = vsel %vm200_vm1, %v199_v10, 0.0  ;;  %v513_v19 = vsub.s32 %v510_v15, %v512_v16  ;;  %s1383_s18 = smov (!%p177_p7, %s995_s18), 7 }
  0x36   : > { %202 = vadd.xlane.f32.xlu0 %v201_v7  ;;  %208 = vadd.xlane.f32.xlu1 %v207_v8  ;;  %s996_s24 = sshll.u32 %s1383_s18, 2 }
  0x37   : > { %1033 = vmatmul.mubr.msk.f32.vlgmr.msra.gmra.mrb[0].mxu0 %vm200_vm1, %v188_v1  ;;  %1038 = vmatmul.mubr.msk.f32.vlgmr.msra.gmra.mrb[0].mxu1 %vm200_vm1, %v189_v2  ;;  %s180_s27 = scalar_lea.vmem %s1373_s1, %s996_s24  ;;  %s186_s28 = scalar_lea.vmem %s1374_s2, %s996_s24 }
  0x38   : > { %1041 = vmatpush3.xpose.msk.msra.mxu0 %vm200_vm1, %v190_v3  ;;  %1046 = vmatpush3.xpose.msk.msra.mxu1 %vm200_vm1, %v191_v6  ;;  %v192_v9 = vld [vmem:[%s180_s27] sm:$0x7]  ;;  %v194_v15 = vld [vmem:[%s180_s27 + $0x8] sm:$0x7] }
  0x39   : > { %1042 = vmatprep.mubr.msk.f32.mxu0 %vm1199_vm0, %v1198_v0  ;;  %1047 = vmatprep.mubr.msk.f32.mxu1 %vm1199_vm0, %v1198_v0 }
  0x3a   : > { %1050 = vmatprep.subr.mxu0 %v1198_v0  ;;  %1055 = vmatprep.subr.mxu1 %v1198_v0 }
  0x3b   : > { %1043 = vmatmul.mubr.msk.f32.vlgmr.msra.gmra.mrb[2].mxu0 %vm200_vm1, %v190_v3  ;;  %1048 = vmatmul.mubr.msk.f32.vlgmr.msra.gmra.mrb[2].mxu1 %vm200_vm1, %v191_v6 }
  0x3c   : > { %1052 = vmatprep.mubr.msk.f32.mxu0 %vm1199_vm0, %v1198_v0  ;;  %1057 = vmatprep.mubr.msk.f32.mxu1 %vm1199_vm0, %v1198_v0 }
  0x3d   : > { %205 = vadd.xlane.f32.xlu0 %v204_v11  ;;  %211 = vadd.xlane.f32.xlu1 %v210_v12  ;;  %v193_v11 = vld [vmem:[%s180_s27 + $0x4] sm:$0x7] }
  0xc3   : > { %v203_v14 = vpop.xlane.xlu0 %202  ;;  %v209_v17 = vpop.xlane.xlu1 %208 }
  0xc4   : > { %v514_v22 = vrot.slane %v203_v14, %v513_v19  ;;  %v522_v25 = vrot.slane %v209_v17, %v513_v19 }
  0xc6   : > { %v561_v28 = vadd.f32 %v514_v22, %v203_v14  ;;  %v563_v36 = vadd.f32 %v522_v25, %v209_v17  ;;  %v195_v17 = vld [vmem:[%s180_s27 + $0xc] sm:$0x7] }
  0xca   : > { %v206_v18 = vpop.xlane.xlu0 %205  ;;  %v212_v21 = vpop.xlane.xlu1 %211 }
  0xcb   : > { %v518_v20 = vrot.slane %v206_v18, %v513_v19  ;;  %v526_v24 = vrot.slane %v212_v21, %v513_v19 }
  0xcd   : > { %v562_v23 = vadd.f32 %v518_v20, %v206_v18  ;;  %v564_v35 = vadd.f32 %v526_v24, %v212_v21 }
 0x10a   : > { %v282_v26 = vpop.f32.mrb[0].mxu0  ;;  %v355_v27 = vpop.f32.mrb[0].mxu1 }
 0x10b   : > { %v565_v29 = vmul.f32 2.0, %v282_v26  ;;  %v566_v30 = vmul.f32 2.0, %v355_v27  ;;  %v1034_v31 = vpop.f32.mrb[1].mxu0  ;;  %v1039_v32 = vpop.f32.mrb[1].mxu1 }
 0x10d   : > { %v569_v33 = vsub.f32 %v561_v28, %v565_v29  ;;  %v570_v34 = vsub.f32 %v562_v23, %v566_v30 }
 0x10e   : > { %v428_v37 = vpop.f32.mrb[2].mxu0  ;;  %v501_v38 = vpop.f32.mrb[2].mxu1 }
 0x10f   : > { %v573_v39 = vmax.f32 %v569_v33, 0.0  ;;  %v574_v40 = vmax.f32 %v570_v34, 0.0  ;;  %v567_v41 = vmul.f32 2.0, %v428_v37  ;;  %v568_v42 = vmul.f32 2.0, %v501_v38  ;;  %v1044_v43 = vpop.f32.mrb[3].mxu0  ;;  %v1049_v44 = vpop.f32.mrb[3].mxu1 }
 0x111   : > { %v577_v45 = vmul.f32 -10.0, %v573_v39  ;;  %v578_v46 = vmul.f32 -10.0, %v574_v40  ;;  %v571_v47 = vsub.f32 %v563_v36, %v567_v41  ;;  %v572_v48 = vsub.f32 %v564_v35, %v568_v42 }
 0x113   : > { %v581_v49 = vmul.f32 1.442695, %v577_v45  ;;  %v583_v50 = vmul.f32 1.442695, %v578_v46  ;;  %v575_v51 = vmax.f32 %v571_v47, 0.0  ;;  %v576_v52 = vmax.f32 %v572_v48, 0.0 }
 0x115   : > { %1113 = vpow2.f32 %v581_v49  ;;  %v579_v53 = vmul.f32 -10.0, %v575_v51  ;;  %v580_v54 = vmul.f32 -10.0, %v576_v52 }
 0x116   : > { %1115 = vpow2.f32 %v583_v50 }
 0x117   : > { %v585_v55 = vmul.f32 1.442695, %v579_v53  ;;  %v587_v56 = vmul.f32 1.442695, %v580_v54 }
 0x119   : > { %1117 = vpow2.f32 %v585_v55 }
 0x11a   : > { %1119 = vpow2.f32 %v587_v56 }
 0x11f   : > { %v1114_v57 = vpop.eup %1113 }
 0x120   : > { %v1116_v58 = vpop.eup %1115  ;;  %v590_v59 = vsel %vm589_vm2, %v1114_v57, 0.0 }
 0x121   : > { %591 = vadd.xlane.f32.xlu0 %v590_v59  ;;  %v593_v60 = vsel %vm589_vm2, %v1116_v58, 0.0 }
 0x122   : > { %594 = vadd.xlane.f32.xlu1 %v593_v60 }
 0x123   : > { %v1118_v61 = vpop.eup %1117 }
 0x124   : > { %v1120_v62 = vpop.eup %1119  ;;  %v596_v63 = vsel %vm589_vm2, %v1118_v61, 0.0 }
 0x125   : > { %597 = vadd.xlane.f32.xlu0 %v596_v63  ;;  %v599_v1 = vsel %vm589_vm2, %v1120_v62, 0.0 }
 0x126   : > { %600 = vadd.xlane.f32.xlu1 %v599_v1 }
 0x1ae   : > { %v592_v2 = vpop.xlane.xlu0 %591 }
 0x1af   : > { %v595_v3 = vpop.xlane.xlu1 %594  ;;  %1121 = vrcp.f32 %v592_v2 }
 0x1b0   : > { %1123 = vrcp.f32 %v595_v3 }
 0x1b2   : > { %v598_v4 = vpop.xlane.xlu0 %597 }
 0x1b3   : > { %v601_v5 = vpop.xlane.xlu1 %600  ;;  %1125 = vrcp.f32 %v598_v4 }
 0x1b4   : > { %1127 = vrcp.f32 %v601_v5 }
 0x1b9   : > { %v1122_v6 = vpop.eup %1121 }
 0x1ba   : > { %v1124_v7 = vpop.eup %1123  ;;  %v606_v8 = vmul.f32 %v1122_v6, %v1114_v57 }
 0x1bb   : > { %v607_v10 = vmul.f32 %v1124_v7, %v1116_v58 }
 0x1bc   : > { %1051 = vmatpush3.msra.mxu0 %v606_v8 }
 0x1bd   : > { %v1126_v12 = vpop.eup %1125  ;;  %1056 = vmatpush3.msra.mxu1 %v607_v10  ;;  %1053 = vmatmul.mubr.msk.f32.vlgmr.msra.gmra.mrb[4].mxu0 %vm589_vm2, %v192_v9 }
 0x1be   : > { %v1128_v13 = vpop.eup %1127  ;;  %1060 = vmatprep.subr.mxu0 %v1198_v0  ;;  %1065 = vmatprep.subr.mxu1 %v1198_v0  ;;  %v608_v14 = vmul.f32 %v1126_v12, %v1118_v61 }
 0x1bf   : > { %1058 = vmatmul.mubr.msk.f32.vlgmr.msra.gmra.mrb[4].mxu1 %vm589_vm2, %v193_v11  ;;  %v609_v16 = vmul.f32 %v1128_v13, %v1120_v62  ;;  %1062 = vmatprep.mubr.msk.f32.mxu0 %vm1199_vm0, %v1198_v0 }
 0x1c0   : > { %1061 = vmatpush3.msra.mxu0 %v608_v14  ;;  %1067 = vmatprep.mubr.msk.f32.mxu1 %vm1199_vm0, %v1198_v0 }
 0x1c1   : > { %1066 = vmatpush3.msra.mxu1 %v609_v16  ;;  %1063 = vmatmul.mubr.msk.f32.vlgmr.msra.gmra.mrb[6].mxu0 %vm589_vm2, %v194_v15 }
 0x1c3   : > { %1068 = vmatmul.mubr.msk.f32.vlgmr.msra.gmra.mrb[6].mxu1 %vm589_vm2, %v195_v17 }
 0x290   : > { %v679_v18 = vpop.f32.mrb[4].mxu0 }
 0x291   : > { %903 = vst.msk [vmem:[%s186_s28] sm:$0x7] %vm902_vm3, %v679_v18  ;;  %v1054_v19 = vpop.f32.mrb[5].mxu0 }
 0x292   : > { %v752_v20 = vpop.f32.mrb[4].mxu1 }
 0x293   : > { %904 = vst.msk [vmem:[%s186_s28 + $0x4] sm:$0x7] %vm902_vm3, %v752_v20  ;;  %v1059_v21 = vpop.f32.mrb[5].mxu1 }
 0x294   : > { %v825_v22 = vpop.f32.mrb[6].mxu0 }
 0x295   : > { %905 = vst.msk [vmem:[%s186_s28 + $0x8] sm:$0x7] %vm902_vm3, %v825_v22  ;;  %v1064_v0 = vpop.f32.mrb[7].mxu0 }
 0x296   : > { %v898_v23 = vpop.f32.mrb[6].mxu1 }
 0x297   : > { %906 = vst.msk [vmem:[%s186_s28 + $0xc] sm:$0x7] %vm902_vm3, %v898_v23  ;;  %v1069_v24 = vpop.f32.mrb[7].mxu1 }
 0x298 PF: > { %p12_p8 = scmp.ge.s32.totalorder %s1235_s14, 4   ;;  %s1378_s9 = smov %s1185_s10 }
 0x299   : > { %s1379_s10 = smov %s1189_s11  ;;  %s1380_s11 = smov %s1245_s17 }
 0x29a   : > { %s1381_s12 = smov %s1235_s14  ;;  %14 = sbr.rel (!%p12_p8) target bundleno = 3 (0x3), region = 71 }
 0x2a1   :  { %929 = vsyncpa [#allocation3], 1 }
 0x2a2   :  { %931 = vsyncpa [#allocation3 + $0x1], 1 }

</bundles_post_ra>
